<compile_context>
chip_gen: v6e
topology: v6e:2x2x1
jax: 0.10.0
libtpu: 0.0.40
codegen_flags: <defaults>
</compile_context>

<pallas_src>
import functools

import jax
import jax.numpy as jnp
from jax.experimental import pallas as pl
from jax.experimental.pallas import tpu as pltpu

_LANE = 128     # vreg lane width
_SUBLANE = 8    # f32 sublane width


def _cdiv(a, b):
    return (a + b - 1) // b


def _round_up(x, m):
    return ((x + m - 1) // m) * m


def _sublane_multiple(dtype):
    # 8 for 4-byte dtypes, 16 for bf16 (packed sublanes), 32 for int8.
    return _SUBLANE * max(1, 4 // jnp.dtype(dtype).itemsize)


def _vmem_tile_bytes(rows, cols, dtype):
    # Size of one VMEM block after (sublane, 128-lane) layout padding.
    it = jnp.dtype(dtype).itemsize
    return _round_up(rows, _sublane_multiple(dtype)) * _round_up(cols, _LANE) * it


def _mlp_kernel(x_ref, w1_ref, b1_ref, w2_ref, b2_ref, w3_ref, b3_ref, o_ref):
    """Fused fc1 -> ReLU -> fc2 -> ReLU -> fc3 for one batch tile.

    Matmuls run on the MXU in the weights' dtype (bf16 by default) with f32
    accumulation; the bias add + ReLU epilogue stays f32 so v5e's VPU (no
    bf16 elementwise path) never sees bf16 math.
    """
    cd = w1_ref.dtype
    x = x_ref[...].astype(cd)          # no-op: wrapper already casts x to cd

    h = jnp.dot(x, w1_ref[...], preferred_element_type=jnp.float32)
    h = jnp.maximum(h + b1_ref[...], 0.0)

    h = jnp.dot(h.astype(cd), w2_ref[...], preferred_element_type=jnp.float32)
    h = jnp.maximum(h + b2_ref[...], 0.0)

    out = jnp.dot(h.astype(cd), w3_ref[...], preferred_element_type=jnp.float32)
    o_ref[...] = (out + b3_ref[...]).astype(o_ref.dtype)


@functools.partial(jax.jit, static_argnames=("batch_tile",))
def environment_representation_forward(observation, params, *, batch_tile=512):
    """Forward pass of EnvironmentRepresentation via one fused Pallas kernel.

    `params` should come from `prepare_params` (weights in the compute dtype,
    biases f32, shapes (in, out) / (1, out)).
    """
    w1, b1, w2, b2, w3, b3 = params
    batch, input_dim = observation.shape
    fc1_dims, fc2_dims, n_actions = w1.shape[1], w2.shape[1], w3.shape[1]
    cd = w1.dtype

    # Balanced batch tiling: minimal padding, big tiles (fewer ~0.35us grid
    # steps), but >=8 steps for large batches so megacore (v7x) keeps >=4
    # double-buffered steps per TensorCore.
    n_steps = max(_cdiv(batch, batch_tile), min(8, _cdiv(batch, 256)))
    tb = _round_up(_cdiv(batch, n_steps), _sublane_multiple(cd))
    batch_p = tb * n_steps

    # Zero-pad only the batch remainder (explicit, so padded rows are zeros,
    # never garbage); feature dims stay at their real width. The cast to the
    # compute dtype fuses with the pad and halves the x HBM read for bf16.
    x_p = jnp.pad(observation.astype(cd), ((0, batch_p - batch), (0, 0)))

    def resident(shape):
        # Weights/biases: same block every grid step -> DMA'd once and kept
        # VMEM-resident by the pipeliner. Blocks are only a few KB each, so
        # the default double-buffering costs nothing (pl.Buffered(1) skipped
        # on purpose -- not worth any compile risk at this size).
        return pl.BlockSpec(shape, lambda i: (0, 0))

    grid_spec = pltpu.PrefetchScalarGridSpec(
        num_scalar_prefetch=0,
        grid=(n_steps,),
        in_specs=[
            pl.BlockSpec((tb, input_dim), lambda i: (i, 0)),   # x: streamed
            resident((input_dim, fc1_dims)), resident((1, fc1_dims)),
            resident((fc1_dims, fc2_dims)), resident((1, fc2_dims)),
            resident((fc2_dims, n_actions)), resident((1, n_actions)),
        ],
        # Narrow (n_actions-wide) output: masked vst, but up to 32x less HBM
        # writeback than a 128-lane padded slab and no follow-on slice copy.
        out_specs=pl.BlockSpec((tb, n_actions), lambda i: (i, 0)),
    )

    # Advisory cost estimate on real (unpadded) feature dims.
    def _nbytes(a):
        return int(a.size) * jnp.dtype(a.dtype).itemsize

    flops = 2 * batch_p * (input_dim * fc1_dims + fc1_dims * fc2_dims
                           + fc2_dims * n_actions)
    w_bytes = sum(_nbytes(a) for a in (w1, b1, w2, b2, w3, b3))
    io_bytes = (batch_p * input_dim * jnp.dtype(cd).itemsize
                + batch_p * n_actions * 4)
    cost = pl.CostEstimate(flops=int(flops), transcendentals=0,
                           bytes_accessed=int(w_bytes + io_bytes))

    # Actual scoped-VMEM need (layout-padded blocks, double-buffered) with 2x
    # slack; clamped to 32 MiB -- safe on v7x (64 MiB/TC) and v5e/v6e (128 MiB).
    vmem_need = (
        2 * _vmem_tile_bytes(tb, input_dim, cd)                 # x in-flight bufs
        + 2 * _vmem_tile_bytes(tb, n_actions, jnp.float32)      # out in-flight bufs
        + 2 * sum(_vmem_tile_bytes(a.shape[0], a.shape[1], a.dtype)
                  for a in (w1, b1, w2, b2, w3, b3))            # resident params
        + 3 * _vmem_tile_bytes(tb, max(fc1_dims, fc2_dims), jnp.float32)  # temps
    )
    vmem_bytes = int(min(max(2 * vmem_need, 4 << 20), 32 << 20))

    out_p = pl.pallas_call(
        _mlp_kernel,
        out_shape=jax.ShapeDtypeStruct((batch_p, n_actions), jnp.float32),
        grid_spec=grid_spec,
        compiler_params=pltpu.CompilerParams(
            # Batch axis is embarrassingly parallel -> shards across both
            # TensorCores on v7x; harmless on single-TC v5e/v6e.
            dimension_semantics=("parallel",),
            vmem_limit_bytes=vmem_bytes,
        ),
        cost_estimate=cost,
    )(x_p, w1, b1, w2, b2, w3, b3)

    # Batch-only slice (no feature slice needed); a no-op when batch_p==batch.
    return out_p[:batch]


def init_params(key, input_dim, fc1_dims, fc2_dims, n_actions):
    """PyTorch-style uniform(+/- 1/sqrt(fan_in)) init, f32.

    Weights stored (in_features, out_features); biases kept 2D (1, out).
    """
    ks = jax.random.split(key, 6)

    def linear(kw, kb, fan_in, fan_out):
        bound = 1.0 / jnp.sqrt(jnp.float32(fan_in))
        w = jax.random.uniform(kw, (fan_in, fan_out), jnp.float32, -bound, bound)
        b = jax.random.uniform(kb, (1, fan_out), jnp.float32, -bound, bound)
        return w, b

    w1, b1 = linear(ks[0], ks[1], input_dim, fc1_dims)
    w2, b2 = linear(ks[2], ks[3], fc1_dims, fc2_dims)
    w3, b3 = linear(ks[4], ks[5], fc2_dims, n_actions)
    return (w1, b1, w2, b2, w3, b3)


def prepare_params(params, compute_dtype=jnp.bfloat16):
    """One-time (outside jit) prep: cast weights to the compute dtype (bf16
    default -> halved weight DMA + single-pass MXU path on all generations);
    biases stay f32 for the f32 bias+ReLU epilogue."""
    w1, b1, w2, b2, w3, b3 = params
    cd = jnp.dtype(compute_dtype)
    return (w1.astype(cd), b1.reshape(1, -1).astype(jnp.float32),
            w2.astype(cd), b2.reshape(1, -1).astype(jnp.float32),
            w3.astype(cd), b3.reshape(1, -1).astype(jnp.float32))


def reference_forward(observation, params):
    """Pure-JAX reference mirroring the kernel's dtype path (same casts)."""
    w1, b1, w2, b2, w3, b3 = params
    cd = w1.dtype
    x = jnp.dot(observation.astype(cd), w1,
                preferred_element_type=jnp.float32) + b1
    x = jnp.maximum(x, 0.0)
    x = jnp.dot(x.astype(cd), w2, preferred_element_type=jnp.float32) + b2
    x = jnp.maximum(x, 0.0)
    return jnp.dot(x.astype(cd), w3, preferred_element_type=jnp.float32) + b3


# TODO(synk): the module's Adam optimizer / device plumbing is training-side
# and intentionally not part of the forward kernel.

if __name__ == "__main__":
    key = jax.random.PRNGKey(0)
    k_obs, k_params, k_big = jax.random.split(key, 3)

    # Small shapes consistent with the module's constructor.
    batch, input_dim, fc1_dims, fc2_dims, n_actions = 8, 16, 32, 32, 4

    observation = jax.random.normal(k_obs, (batch, input_dim), dtype=jnp.float32)
    raw_params = init_params(k_params, input_dim, fc1_dims, fc2_dims, n_actions)

    # f32 path: exact vs. reference.
    params_f32 = prepare_params(raw_params, compute_dtype=jnp.float32)
    out = environment_representation_forward(observation, params_f32)
    out = jax.block_until_ready(out)
    ref = reference_forward(observation, params_f32)
    assert out.shape == (batch, n_actions)
    assert jnp.allclose(out, ref, atol=1e-5, rtol=1e-5)

    # Default bf16 MXU path (f32 accumulation + f32 epilogue), compared
    # against a reference applying the same casts.
    params_bf16 = prepare_params(raw_params)
    out_bf16 = environment_representation_forward(observation, params_bf16)
    out_bf16 = jax.block_until_ready(out_bf16)
    ref_bf16 = reference_forward(observation, params_bf16)
    assert jnp.allclose(out_bf16, ref_bf16, atol=2e-3, rtol=2e-3)

    # Larger, non-aligned batch: exercises the balanced multi-step grid
    # (f32: n_steps=2, tb=152 -> batch_p=304) and the batch-remainder padding.
    big_batch = 300
    big_obs = jax.random.normal(k_big, (big_batch, input_dim), dtype=jnp.float32)
    out_big = environment_representation_forward(big_obs, params_f32)
    out_big = jax.block_until_ready(out_big)
    ref_big = reference_forward(big_obs, params_f32)
    assert out_big.shape == (big_batch, n_actions)
    assert jnp.allclose(out_big, ref_big, atol=1e-4, rtol=1e-4)

    # bf16 on the multi-step grid as well (tb rounds to the bf16 sublane
    # multiple of 16 -> 160, batch_p=320).
    out_big_bf16 = environment_representation_forward(big_obs, params_bf16)
    out_big_bf16 = jax.block_until_ready(out_big_bf16)
    ref_big_bf16 = reference_forward(big_obs, params_bf16)
    assert out_big_bf16.shape == (big_batch, n_actions)
    assert jnp.allclose(out_big_bf16, ref_big_bf16, atol=2e-3, rtol=2e-3)

    print("KERNEL_OK")
</pallas_src>

<mosaic_0001>
module attributes {stable_mosaic.version = 11 : i64} {
  func.func @_mlp_kernel(%arg0: i32, %arg1: memref<8x16xf32, #tpu.memory_space<vmem>>, %arg2: memref<16x32xf32, #tpu.memory_space<vmem>>, %arg3: memref<1x32xf32, #tpu.memory_space<vmem>>, %arg4: memref<32x32xf32, #tpu.memory_space<vmem>>, %arg5: memref<1x32xf32, #tpu.memory_space<vmem>>, %arg6: memref<32x4xf32, #tpu.memory_space<vmem>>, %arg7: memref<1x4xf32, #tpu.memory_space<vmem>>, %arg8: memref<8x4xf32, #tpu.memory_space<vmem>>) attributes {dimension_semantics = [#tpu.dimension_semantics<parallel>], iteration_bounds = array<i64: 1>, scalar_prefetch = 0 : i64, scratch_operands = 0 : i64, tpu.core_type = #tpu.core_type<tc>, window_params = [{transform_indices = @transform_0, window_bounds = array<i64: 8, 16>}, {pipeline_mode = #tpu.pipeline_mode<synchronous>, transform_indices = @transform_1, window_bounds = array<i64: 16, 32>}, {pipeline_mode = #tpu.pipeline_mode<synchronous>, transform_indices = @transform_2, window_bounds = array<i64: 1, 32>}, {pipeline_mode = #tpu.pipeline_mode<synchronous>, transform_indices = @transform_3, window_bounds = array<i64: 32, 32>}, {pipeline_mode = #tpu.pipeline_mode<synchronous>, transform_indices = @transform_4, window_bounds = array<i64: 1, 32>}, {pipeline_mode = #tpu.pipeline_mode<synchronous>, transform_indices = @transform_5, window_bounds = array<i64: 32, 4>}, {pipeline_mode = #tpu.pipeline_mode<synchronous>, transform_indices = @transform_6, window_bounds = array<i64: 1, 4>}, {transform_indices = @transform_7, window_bounds = array<i64: 8, 4>}]} {
    %c0 = arith.constant 0 : index
    %c0_0 = arith.constant 0 : index
    %0 = vector.load %arg1[%c0, %c0_0] : memref<8x16xf32, #tpu.memory_space<vmem>>, vector<8x16xf32>
    %c0_1 = arith.constant 0 : index
    %c0_2 = arith.constant 0 : index
    %1 = vector.load %arg2[%c0_1, %c0_2] : memref<16x32xf32, #tpu.memory_space<vmem>>, vector<16x32xf32>
    %cst = arith.constant dense<0.000000e+00> : vector<8x32xf32>
    %2 = tpu.matmul %0, %1, %cst {dimension_numbers = #tpu.dot_dimension_numbers<[1], [0], [0], [1], [0, 0, 1, 1], [], []>} : vector<8x16xf32>, vector<16x32xf32>, vector<8x32xf32> -> vector<8x32xf32>
    %c0_3 = arith.constant 0 : index
    %c0_4 = arith.constant 0 : index
    %3 = vector.load %arg3[%c0_3, %c0_4] : memref<1x32xf32, #tpu.memory_space<vmem>>, vector<1x32xf32>
    %4 = vector.broadcast %3 : vector<1x32xf32> to vector<8x32xf32>
    %5 = arith.addf %2, %4 : vector<8x32xf32>
    %cst_5 = arith.constant 0.000000e+00 : f32
    %6 = vector.broadcast %cst_5 : f32 to vector<8x32xf32>
    %7 = arith.maximumf %5, %6 : vector<8x32xf32>
    %c0_6 = arith.constant 0 : index
    %c0_7 = arith.constant 0 : index
    %8 = vector.load %arg4[%c0_6, %c0_7] : memref<32x32xf32, #tpu.memory_space<vmem>>, vector<32x32xf32>
    %cst_8 = arith.constant dense<0.000000e+00> : vector<8x32xf32>
    %9 = tpu.matmul %7, %8, %cst_8 {dimension_numbers = #tpu.dot_dimension_numbers<[1], [0], [0], [1], [0, 0, 1, 1], [], []>} : vector<8x32xf32>, vector<32x32xf32>, vector<8x32xf32> -> vector<8x32xf32>
    %c0_9 = arith.constant 0 : index
    %c0_10 = arith.constant 0 : index
    %10 = vector.load %arg5[%c0_9, %c0_10] : memref<1x32xf32, #tpu.memory_space<vmem>>, vector<1x32xf32>
    %11 = vector.broadcast %10 : vector<1x32xf32> to vector<8x32xf32>
    %12 = arith.addf %9, %11 : vector<8x32xf32>
    %cst_11 = arith.constant 0.000000e+00 : f32
    %13 = vector.broadcast %cst_11 : f32 to vector<8x32xf32>
    %14 = arith.maximumf %12, %13 : vector<8x32xf32>
    %c0_12 = arith.constant 0 : index
    %c0_13 = arith.constant 0 : index
    %15 = vector.load %arg6[%c0_12, %c0_13] : memref<32x4xf32, #tpu.memory_space<vmem>>, vector<32x4xf32>
    %cst_14 = arith.constant dense<0.000000e+00> : vector<8x4xf32>
    %16 = tpu.matmul %14, %15, %cst_14 {dimension_numbers = #tpu.dot_dimension_numbers<[1], [0], [0], [1], [0, 0, 1, 1], [], []>} : vector<8x32xf32>, vector<32x4xf32>, vector<8x4xf32> -> vector<8x4xf32>
    %c0_15 = arith.constant 0 : index
    %c0_16 = arith.constant 0 : index
    %17 = vector.load %arg7[%c0_15, %c0_16] : memref<1x4xf32, #tpu.memory_space<vmem>>, vector<1x4xf32>
    %18 = vector.broadcast %17 : vector<1x4xf32> to vector<8x4xf32>
    %19 = arith.addf %16, %18 : vector<8x4xf32>
    %c0_17 = arith.constant 0 : index
    %c0_18 = arith.constant 0 : index
    %20 = vector.load %arg8[%c0_17, %c0_18] : memref<8x4xf32, #tpu.memory_space<vmem>>, vector<8x4xf32>
    tpu.vector_store %arg8[%c0_17, %c0_18], %19 {strides = array<i32>} : memref<8x4xf32, #tpu.memory_space<vmem>>, vector<8x4xf32>,
    return
  }
  func.func @transform_0(%arg0: i32) -> (i32, i32) {
    %c0_i32 = arith.constant 0 : i32
    %c0_i32_0 = arith.constant 0 : i32
    return %arg0, %c0_i32 : i32, i32
  }
  func.func @transform_1(%arg0: i32) -> (i32, i32) {
    %c0_i32 = arith.constant 0 : i32
    %c0_i32_0 = arith.constant 0 : i32
    %c0_i32_1 = arith.constant 0 : i32
    return %c0_i32, %c0_i32_0 : i32, i32
  }
  func.func @transform_2(%arg0: i32) -> (i32, i32) {
    %c0_i32 = arith.constant 0 : i32
    %c0_i32_0 = arith.constant 0 : i32
    %c0_i32_1 = arith.constant 0 : i32
    return %c0_i32, %c0_i32_0 : i32, i32
  }
  func.func @transform_3(%arg0: i32) -> (i32, i32) {
    %c0_i32 = arith.constant 0 : i32
    %c0_i32_0 = arith.constant 0 : i32
    %c0_i32_1 = arith.constant 0 : i32
    return %c0_i32, %c0_i32_0 : i32, i32
  }
  func.func @transform_4(%arg0: i32) -> (i32, i32) {
    %c0_i32 = arith.constant 0 : i32
    %c0_i32_0 = arith.constant 0 : i32
    %c0_i32_1 = arith.constant 0 : i32
    return %c0_i32, %c0_i32_0 : i32, i32
  }
  func.func @transform_5(%arg0: i32) -> (i32, i32) {
    %c0_i32 = arith.constant 0 : i32
    %c0_i32_0 = arith.constant 0 : i32
    %c0_i32_1 = arith.constant 0 : i32
    return %c0_i32, %c0_i32_0 : i32, i32
  }
  func.func @transform_6(%arg0: i32) -> (i32, i32) {
    %c0_i32 = arith.constant 0 : i32
    %c0_i32_0 = arith.constant 0 : i32
    %c0_i32_1 = arith.constant 0 : i32
    return %c0_i32, %c0_i32_0 : i32, i32
  }
  func.func @transform_7(%arg0: i32) -> (i32, i32) {
    %c0_i32 = arith.constant 0 : i32
    %c0_i32_0 = arith.constant 0 : i32
    return %arg0, %c0_i32 : i32, i32
  }
}

</mosaic_0001>

<bundles_post_ra>
// kernel: environment_representation_forward.1
= control target key start
LH: loop header
LB: loop body
LE: loop exit
PB: predicated region body
PF: predicated region fallthrough
CT: control target
= control target key end

     0   :  { %12 = vsyncpa [#allocation3], 0  ;;  %s506_s0 = inlined_call_operand.vmem [shape: f32[8,16], index: 0, kind: input, shape index: {}]   ;;  %s507_s1 = inlined_call_operand.hbm [shape: f32[16,32], index: 1, kind: input, shape index: {}]   ;;  %s508_s2 = inlined_call_operand.vmem [shape: f32[1,32], index: 2, kind: input, shape index: {}]   ;;  %s509_s3 = inlined_call_operand.vmem [shape: f32[32,32], index: 3, kind: input, shape index: {}]   ;;  %s510_s4 = inlined_call_operand.hbm [shape: f32[1,32], index: 4, kind: input, shape index: {}]   ;;  %s511_s5 = inlined_call_operand.vmem [shape: f32[32,4], index: 5, kind: input, shape index: {}]   ;;  %s512_s6 = inlined_call_operand.vmem [shape: f32[1,4], index: 6, kind: input, shape index: {}]   ;;  %s513_s7 = inlined_call_operand.vmem [shape: f32[8,4], index: 7, kind: output, shape index: {}]  }
   0x1   :  { %13 = vsyncpa [#allocation5], 0  ;;  %s413_s24 = smov [#allocation2]  }
   0x2   :  { %s21_s25 = sshll.u32 %s413_s24, 4  ;;  %s22_s25 = int_to_ptr.vmem [resolvable:$true] %s21_s25 }
   0x3   :  { %s377_s26 = scalar_lea.vmem %s22_s25, 256  ;;  %p382_p1 = scmp.lt.s32.totalorder %s22_s25, %s22_s25 }
   0x4   :  { %p378_p0 = scmp.ne.s32.totalorder %s22_s25, %s377_s26  ;;  %p383_p2 = scmp.lt.s32.totalorder %s377_s26, %s377_s26 }
   0x6   :  { %p384_p3 = por %p383_p2, %p382_p1 }
   0x8   :  { %p385_p4 = pnand %p384_p3, %p378_p0 }
   0xa   :  { %388 = shalt.err (!%p385_p4)
}
   0xb   :  { %s414_s27 = smov 128   ;;  %s415_s28 = smov 8  }
   0xc   :  { %27 = dma.hbm_to_vmem [thread:$0]  %s507_s1, 256, %s22_s25, [#allocation3], %s414_s27, %s414_s27, %s415_s28  }
   0xd   :  { %s416_s8 = smov [#allocation4]  }
   0xe   :  { %s38_s9 = sshll.u32 %s416_s8, 4  ;;  %s39_s9 = int_to_ptr.vmem [resolvable:$true] %s38_s9 }
   0xf   :  { %s397_s10 = scalar_lea.vmem %s39_s9, 16  ;;  %s401_s11 = scalar_lea.vmem %s39_s9, 32 }
  0x10   :  { %p398_p5 = scmp.ne.s32.totalorder %s39_s9, %s397_s10  ;;  %p402_p6 = scmp.lt.s32.totalorder %s39_s9, %s39_s9 }
  0x11   :  { %p403_p7 = scmp.lt.s32.totalorder %s401_s11, %s397_s10 }
  0x13   :  { %p404_p8 = por %p403_p7, %p402_p6 }
  0x15   :  { %p405_p9 = pnand %p404_p8, %p398_p5 }
  0x17   :  { %408 = shalt.err (!%p405_p9)
}
  0x18   :  { %41 = dma.hbm_to_vmem [thread:$0]  %s510_s4, 16, %s39_s9, [#allocation5]  }
  0x19   :  { %409 = dma.done.wait [#allocation3], 256  }
  0x1a   :  { %410 = vsyncadd [#allocation3], 4294967040 }
  0x1b   :  { %411 = dma.done.wait [#allocation5], 16  }
  0x1c   :  { %412 = vsyncadd [#allocation5], 4294967280  ;;  %v417_v0 = vmov 0.0   ;;  %vm418_vm0 = vmmov 0   ;;  %v54_v1 = vld [vmem:[#allocation2 + $0x8] sm:$0xff]  ;;  %v53_v2 = vld [vmem:[#allocation2] sm:$0xff] }
  0x1d   :  { %334 = vmatprep.subr.mxu0 %v417_v0  ;;  %338 = vmatprep.mubr.msk.f32.mxu0 %vm418_vm0, %v417_v0  ;;  %v52_v3 = vld [vmem:[%s506_s0] sm:$0xff]  ;;  %vm62_vm1 = vcmask 130048   ;;  %v140_v4 = vld [vmem:[%s509_s3 + $0x18] sm:$0xff]  ;;  %v139_v5 = vld [vmem:[%s509_s3 + $0x10] sm:$0xff]  ;;  %vm148_vm2 = vcmask 261120   ;;  %vm307_vm3 = vcmask 31744  }
  0x1e   :  { %341 = vmatprep.subr.mxu1 %v417_v0  ;;  %349 = vmatprep.mubr.msk.f32.mxu1 %vm418_vm0, %v417_v0  ;;  %v138_v6 = vld [vmem:[%s509_s3 + $0x8] sm:$0xff]  ;;  %v137_v7 = vld [vmem:[%s509_s3] sm:$0xff]  ;;  %v226_v8 = vld [vmem:[%s511_s5 + $0x18] sm:$0xff] }
  0x1f   :  { %335 = vmatpush3.msra.mxu0 %v54_v1  ;;  %342 = vmatpush3.msra.mxu1 %v140_v4  ;;  %v315_v9 = vld [vmem:[%s508_s2] ss:$0 sm:$0xff]  ;;  %v225_v14 = vld [vmem:[%s511_s5 + $0x10] sm:$0xff]  ;;  %v224_v15 = vld [vmem:[%s511_s5 + $0x8] sm:$0xff] }
  0x20   :  { %336 = vmatprep.subr.mxu0 %v417_v0  ;;  %343 = vmatprep.subr.mxu1 %v417_v0  ;;  %v223_v16 = vld [vmem:[%s511_s5] sm:$0xff]  ;;  %v317_v17 = vld [vmem:[#allocation4] ss:$0 sm:$0xff] }
  0x21   :  { %337 = vmatpush3.msra.mxu0 %v53_v2  ;;  %344 = vmatpush3.msra.mxu1 %v139_v5  ;;  %v319_v22 = vld [vmem:[%s512_s6] ss:$0 sm:$0xff] }
  0x22   :  { %339 = vmatmul.mubr.msk.f32.vlgmr.msra.gmra.mxu0 %vm62_vm1, %v52_v3  ;;  %352 = vmatprep.subr.mxu0 %v417_v0 }
  0x23   :  { %360 = vmatprep.mubr.msk.f32.mxu0 %vm418_vm0, %v417_v0  ;;  %345 = vmatprep.subr.mxu1 %v417_v0 }
  0x24   :  { %346 = vmatpush3.msra.mxu1 %v138_v6  ;;  %353 = vmatpush3.msra.mxu0 %v226_v8 }
  0x25   :  { %347 = vmatprep.subr.mxu1 %v417_v0  ;;  %354 = vmatprep.subr.mxu0 %v417_v0 }
  0x26   :  { %348 = vmatpush3.msra.mxu1 %v137_v7  ;;  %355 = vmatpush3.msra.mxu0 %v225_v14 }
  0x27   :  { %356 = vmatprep.subr.mxu0 %v417_v0 }
  0x28   :  { %357 = vmatpush3.msra.mxu0 %v224_v15 }
  0x29   :  { %358 = vmatprep.subr.mxu0 %v417_v0 }
  0x2a   :  { %359 = vmatpush3.msra.mxu0 %v223_v16 }
  0xe2   :  { %v132_v10 = vpop.f32.mrf.mxu0 }
  0xe3   :  { %v133_v11 = vadd.f32 %v315_v9, %v132_v10 }
  0xe4   :  { %v340_v12 = vpop.f32.mrf.mxu0 }
  0xe5   :  { %v136_v13 = vmax.f32 %v133_v11, 0.0 }
  0xe7   :  { %350 = vmatmul.mubr.msk.f32.vlgmr.msra.gmra.mxu1 %vm148_vm2, %v136_v13 }
 0x1a7   :  { %v218_v18 = vpop.f32.mrf.mxu1 }
 0x1a8   :  { %v219_v19 = vadd.f32 %v317_v17, %v218_v18 }
 0x1a9   :  { %v351_v20 = vpop.f32.mrf.mxu1 }
 0x1aa   :  { %v222_v21 = vmax.f32 %v219_v19, 0.0 }
 0x1ac   :  { %361 = vmatmul.mubr.msk.f32.vlgmr.msra.gmra.mxu0 %vm148_vm2, %v222_v21 }
 0x26c   :  { %v303_v23 = vpop.f32.mrf.mxu0 }
 0x26d   :  { %v304_v24 = vadd.f32 %v319_v22, %v303_v23 }
 0x26e   :  { %v362_v25 = vpop.f32.mrf.mxu0 }
 0x26f   :  { %308 = vst.msk [vmem:[%s513_s7] sm:$0xff] %vm307_vm3, %v304_v24 }
 0x270   :  { %313 = vsyncpa [#allocation3], 1 }
 0x271   :  { %314 = vsyncpa [#allocation5], 1 }

</bundles_post_ra>
